<compile_context>
chip_gen: v5e
topology: v5e:2x2
jax: 0.10.0
libtpu: 0.0.40
codegen_flags: <defaults>
</compile_context>

<pallas_src>
import functools

import jax
import jax.numpy as jnp
from jax.experimental import pallas as pl
from jax.experimental.pallas import tpu as pltpu


def _soft_gate_kernel(w_ref, x_ref, o_ref, *, margin):
    # w_ref: (block_rows, 1) per-row weights  (4D path)
    #     or (1, width)      per-lane weights (2D path)
    # x_ref / o_ref: (block_rows, lane)
    w = w_ref[...].astype(jnp.float32)
    # clip_value: first clamp high to 1 - margin, then clamp low to margin
    # (same order as the PyTorch in-place masked assignments).
    w = jnp.maximum(jnp.minimum(w, 1.0 - margin), margin)
    # custom_STE forward (eval mode): hard threshold at 0.5.
    # TODO(synk): train-mode forward uses stochastic rounding (prob_round_torch);
    # it could be added with pltpu.prng_seed + pltpu.prng_random_bits.  The g_w
    # factor only rescales the backward gradient, so it is irrelevant here.
    gate = (w >= 0.5).astype(x_ref.dtype)
    o_ref[...] = x_ref[...] * gate  # broadcast over rows or lanes


def _pick_block_rows(rows, lane, dtype_bytes):
    """Row-tile size: ~2 MiB per input tile, aligned for the dtype's packing."""
    row_align = 16 if dtype_bytes < 4 else 8
    if rows <= row_align:
        return rows  # full extent: exempt from the (8,128) divisibility rule
    target_bytes = 2 * 1024 * 1024
    max_rows_by_vmem = max(row_align, target_bytes // max(1, lane * dtype_bytes))
    block = min(rows, max_rows_by_vmem, 4096)
    # Prefer >= 2 grid steps so the "parallel" row grid can shard across the
    # two TensorCores on v7x.
    if block >= rows and rows > 2 * row_align:
        block = rows // 2
    block = max(row_align, (block // row_align) * row_align)
    if block >= rows:
        return rows
    return block


def _run_gated_multiply(w2, x2, block_rows, margin):
    """pallas_call wrapper: x2 is (rows, lane); w2 is (block-compatible, *)."""
    rows, lane = x2.shape
    dtype_bytes = x2.dtype.itemsize
    grid = (pl.cdiv(rows, block_rows),)

    # VMEM budget: double-buffered input + output tiles + lane-padded gate tile.
    tile_bytes = block_rows * lane * dtype_bytes
    gate_bytes = block_rows * 128 * 4
    vmem_limit = min(max(2 * (2 * tile_bytes + gate_bytes) + (4 << 20), 16 << 20),
                     100 << 20)

    if w2.shape[0] == 1:
        w_spec = pl.BlockSpec((1, w2.shape[1]), lambda i: (0, 0))       # per-lane gate
    else:
        w_spec = pl.BlockSpec((block_rows, 1), lambda i: (i, 0))        # per-row gate

    return pl.pallas_call(
        functools.partial(_soft_gate_kernel, margin=float(margin)),
        out_shape=jax.ShapeDtypeStruct((rows, lane), x2.dtype),
        grid=grid,
        in_specs=[
            w_spec,
            pl.BlockSpec((block_rows, lane), lambda i: (i, 0)),
        ],
        out_specs=pl.BlockSpec((block_rows, lane), lambda i: (i, 0)),
        compiler_params=pltpu.CompilerParams(
            dimension_semantics=("parallel",),
            vmem_limit_bytes=int(vmem_limit)),
    )(w2, x2)


def soft_gate_forward(x, weights, *, margin=0.0, training_flag=True):
    """Pallas implementation of soft_gate.forward (eval-mode STE).

    NOTE: the PyTorch module also clamps `weights` in place; in this functional
    version the caller should persist jnp.clip(weights, margin, 1 - margin)
    itself if that side effect matters.
    """
    if not training_flag:
        return x

    w32 = weights.astype(jnp.float32)

    if x.ndim == 2:
        n, width = x.shape
        if width < 128:
            # Small lane dim: masked stores + launch overhead make Pallas a
            # loss here; let XLA fuse the tiny elementwise multiply.
            w = jnp.maximum(jnp.minimum(w32, 1.0 - margin), margin)
            gate = (w >= 0.5).astype(x.dtype)
            return x * gate[None, :]
        block_rows = _pick_block_rows(n, width, x.dtype.itemsize)
        return _run_gated_multiply(w32.reshape(1, width), x, block_rows, margin)

    elif x.ndim == 4:
        n, c, h, w_sp = x.shape
        lane = h * w_sp
        rows = n * c
        # Free contiguous reshape: row r = n_idx * C + c_idx -> channel r % C.
        x2 = x.reshape(rows, lane)
        w_rows = jnp.tile(w32.reshape(c), (n,)).reshape(rows, 1)
        block_rows = _pick_block_rows(rows, lane, x.dtype.itemsize)
        out2 = _run_gated_multiply(w_rows, x2, block_rows, margin)
        return out2.reshape(n, c, h, w_sp)

    else:
        raise ValueError("soft_gate expects a 2D or 4D input")


if __name__ == "__main__":
    key = jax.random.PRNGKey(0)
    kx4, kw, kx2, kw_wide = jax.random.split(key, 4)

    width = 4
    weights = jax.random.uniform(kw, (width,), dtype=jnp.float32)
    gate_ref = (jnp.clip(weights, 0.0, 1.0) >= 0.5).astype(jnp.float32)

    # 4D NCHW case (Pallas row-gated kernel): batch=2, channels=4, spatial=16.
    x4 = jax.random.normal(kx4, (2, 4, 16, 16), dtype=jnp.float32)
    y4 = soft_gate_forward(x4, weights, margin=0.0, training_flag=True)
    jax.block_until_ready(y4)
    ref4 = x4 * gate_ref[None, :, None, None]
    assert jnp.allclose(y4, ref4, atol=1e-6), "4D soft_gate mismatch"

    # 2D small-width case (plain-JAX fallback path).
    x2 = jax.random.normal(kx2, (8, width), dtype=jnp.float32)
    y2 = soft_gate_forward(x2, weights, margin=0.0, training_flag=True)
    jax.block_until_ready(y2)
    ref2 = x2 * gate_ref[None, :]
    assert jnp.allclose(y2, ref2, atol=1e-6), "2D soft_gate mismatch"

    # 2D lane-dense case (Pallas lane-gated kernel path).
    wide = 256
    weights_w = jax.random.uniform(kw_wide, (wide,), dtype=jnp.float32)
    x2w = jax.random.normal(kx2, (16, wide), dtype=jnp.float32)
    y2w = soft_gate_forward(x2w, weights_w, margin=0.0, training_flag=True)
    jax.block_until_ready(y2w)
    gate_w = (jnp.clip(weights_w, 0.0, 1.0) >= 0.5).astype(jnp.float32)
    assert jnp.allclose(y2w, x2w * gate_w[None, :], atol=1e-6), "2D wide soft_gate mismatch"

    print("KERNEL_OK")
</pallas_src>

<mosaic_0001>
module attributes {stable_mosaic.version = 11 : i64} {
  func.func @_soft_gate_kernel(%arg0: i32, %arg1: memref<8x1xf32, #tpu.memory_space<vmem>>, %arg2: memref<8x256xf32, #tpu.memory_space<vmem>>, %arg3: memref<8x256xf32, #tpu.memory_space<vmem>>) attributes {dimension_semantics = [#tpu.dimension_semantics<parallel>], iteration_bounds = array<i64: 1>, scalar_prefetch = 0 : i64, scratch_operands = 0 : i64, tpu.core_type = #tpu.core_type<tc>, window_params = [{transform_indices = @transform_0, window_bounds = array<i64: 8, 1>}, {transform_indices = @transform_1, window_bounds = array<i64: 8, 256>}, {transform_indices = @transform_2, window_bounds = array<i64: 8, 256>}]} {
    %c0 = arith.constant 0 : index
    %c0_0 = arith.constant 0 : index
    %0 = vector.load %arg1[%c0, %c0_0] : memref<8x1xf32, #tpu.memory_space<vmem>>, vector<8x1xf32>
    %cst = arith.constant 1.000000e+00 : f32
    %1 = vector.broadcast %cst : f32 to vector<8x1xf32>
    %2 = arith.minimumf %0, %1 : vector<8x1xf32>
    %cst_1 = arith.constant 0.000000e+00 : f32
    %3 = vector.broadcast %cst_1 : f32 to vector<8x1xf32>
    %4 = arith.maximumf %2, %3 : vector<8x1xf32>
    %cst_2 = arith.constant 5.000000e-01 : f32
    %5 = vector.broadcast %cst_2 : f32 to vector<8x1xf32>
    %6 = arith.cmpf oge, %4, %5 : vector<8x1xf32>
    %7 = arith.extui %6 : vector<8x1xi1> to vector<8x1xi32>
    %8 = arith.sitofp %7 : vector<8x1xi32> to vector<8x1xf32>
    %c0_3 = arith.constant 0 : index
    %c0_4 = arith.constant 0 : index
    %9 = vector.load %arg2[%c0_3, %c0_4] : memref<8x256xf32, #tpu.memory_space<vmem>>, vector<8x256xf32>
    %10 = vector.broadcast %8 : vector<8x1xf32> to vector<8x256xf32>
    %11 = arith.mulf %9, %10 : vector<8x256xf32>
    %c0_5 = arith.constant 0 : index
    %c0_6 = arith.constant 0 : index
    %12 = vector.load %arg3[%c0_5, %c0_6] : memref<8x256xf32, #tpu.memory_space<vmem>>, vector<8x256xf32>
    tpu.vector_store %arg3[%c0_5, %c0_6], %11 {strides = array<i32>} : memref<8x256xf32, #tpu.memory_space<vmem>>, vector<8x256xf32>,
    return
  }
  func.func @transform_0(%arg0: i32) -> (i32, i32) {
    %c0_i32 = arith.constant 0 : i32
    %c0_i32_0 = arith.constant 0 : i32
    return %arg0, %c0_i32 : i32, i32
  }
  func.func @transform_1(%arg0: i32) -> (i32, i32) {
    %c0_i32 = arith.constant 0 : i32
    %c0_i32_0 = arith.constant 0 : i32
    return %arg0, %c0_i32 : i32, i32
  }
  func.func @transform_2(%arg0: i32) -> (i32, i32) {
    %c0_i32 = arith.constant 0 : i32
    %c0_i32_0 = arith.constant 0 : i32
    return %arg0, %c0_i32 : i32, i32
  }
}

</mosaic_0001>

<bundles_post_ra>
// kernel: tpu_custom_call.1
= control target key start
LH: loop header
LB: loop body
LE: loop exit
PB: predicated region body
PF: predicated region fallthrough
CT: control target
= control target key end

     0   :  { %7 = vsyncpa [#allocation3], 0  ;;  %s146_s0 = inlined_call_operand.vmem [shape: f32[8,1], index: 0, kind: input, shape index: {}]   ;;  %s147_s1 = inlined_call_operand.hbm [shape: f32[8,256], index: 1, kind: input, shape index: {}]   ;;  %s148_s2 = inlined_call_operand.hbm [shape: f32[8,256], index: 2, kind: output, shape index: {}]  }
   0x1   :  { %8 = vsyncpa [#allocation4], 0  ;;  %s16_s11 = sshll.u32 %s147_s1, 4  ;;  %s118_s12 = smov [#allocation2]   ;;  %s17_s11 = int_to_ptr.hbm [resolvable:$true] %s16_s11 }
   0x2   :  { %s18_s13 = sshll.u32 %s118_s12, 4  ;;  %s19_s13 = int_to_ptr.vmem [resolvable:$true] %s18_s13 }
   0x3   :  { %21 = dma.hbm_to_vmem [thread:$0]  %s17_s11, 256, %s19_s13, [#allocation3]  }
   0x4   :  { %114 = dma.done.wait [#allocation3], 256  }
   0x5   :  { %115 = vsyncadd [#allocation3], 4294967040  ;;  %v119_v0 = vmov 0   ;;  %v26_v1 = vld [vmem:[%s146_s0] sm:$0xff]  ;;  %v120_v4 = vmov 0.0   ;;  %v33_v7 = vld [vmem:[#allocation2 + $0x8] sm:$0xff] }
   0x6   :  { %65 = vset.pattern.permute.xlu0 %v119_v0  ;;  %v27_v2 = vmin.f32 %v26_v1, 1.0  ;;  %v32_v6 = vld [vmem:[#allocation2] sm:$0xff]  ;;  %s121_s1 = smov [#allocation5]   ;;  %s50_s19 = sshll.u32 %s148_s2, 4  ;;  %s51_s19 = int_to_ptr.hbm [resolvable:$true] %s50_s19 }
   0x7   :  { %s48_s16 = sshll.u32 %s121_s1, 4  ;;  %s49_s16 = int_to_ptr.vmem [resolvable:$true] %s48_s16 }
   0x8   :  { %v28_v3 = vmax.f32 %v27_v2, 0.0 }
   0xa   :  { %vm29_vm0 = vcmp.ge.f32.partialorder %v28_v3, 0.5 }
   0xb   :  { %v60_v5 = vsel %vm29_vm0, 1.0, %v120_v4 }
   0xc   :  { %36 = vperm.xlu0 %65, %v60_v5  }
  0x7e   :  { %v37_v8 = vpop.permute.xlu0 %36 }
  0x7f   :  { %v39_v9 = vmul.f32 %v37_v8, %v32_v6  ;;  %v40_v10 = vmul.f32 %v37_v8, %v33_v7 }
  0x81   :  { %41 = vst [vmem:[#allocation5] sm:$0xff] %v39_v9 }
  0x82   :  { %42 = vst [vmem:[#allocation5 + $0x8] sm:$0xff] %v40_v10 }
  0x83   :  { %53 = dma.vmem_to_hbm [thread:$0]  %s49_s16, 256, %s51_s19, [#allocation4]  }
  0x84   :  { %116 = dma.done.wait [#allocation4], 256  }
  0x85   :  { %117 = vsyncadd [#allocation4], 4294967040 }
  0x86   :  { %58 = vsyncpa [#allocation3], 1 }
  0x87   :  { %59 = vsyncpa [#allocation4], 1 }

</bundles_post_ra>
